<compile_context>
chip_gen: v6e
topology: v6e:2x2x1
jax: 0.10.0
libtpu: 0.0.40
codegen_flags: <defaults>
</compile_context>

<pallas_src>
import functools

import jax
import jax.numpy as jnp
from jax.experimental import pallas as pl
from jax.experimental.pallas import tpu as pltpu


def _round_up(n, m):
    return ((n + m - 1) // m) * m


def adapter_kernel(x_ref, wd_ref, bd_ref, wu_ref, bu_ref, o_ref, *, scale):
    # x tile is used both as the matmul input and as the residual (single HBM stream).
    x = x_ref[...]
    # down-proj on the MXU, f32 accumulation.
    down = jnp.dot(x, wd_ref[...], preferred_element_type=jnp.float32)
    down = jnp.maximum(down + bd_ref[...].astype(jnp.float32), 0.0)     # bias + ReLU
    # dropout(p=0.0) == identity
    # up-proj on the MXU (cast activation to the weight dtype so bf16 weights hit the bf16 MXU).
    up = jnp.dot(down.astype(wu_ref.dtype), wu_ref[...],
                 preferred_element_type=jnp.float32)
    up = (up + bu_ref[...].astype(jnp.float32)) * scale
    # residual add in f32, cast back to the output dtype.
    o_ref[...] = (up + x.astype(jnp.float32)).astype(o_ref.dtype)


def parallel_adapter(x, params, *, scale=1.0, tm=256):
    """x: (B, S, D).  params: dict of down/up weights+biases (pre-transposed to (in, out)).

    Equivalent to:  relu(x @ Wd + bd) @ Wu + bu) * scale + x
    Pass bf16 x / params for bf16 I/O + bf16 MXU (epilogue stays f32).
    """
    B, S, D = x.shape
    N = B * S
    x2 = x.reshape(N, D)

    wd = params["w_down"]          # (D, bottleneck)
    bd = params["b_down"]          # (1, bottleneck)
    wu = params["w_up"]            # (bottleneck, D)
    bu = params["b_up"]            # (1, D)
    bneck = wd.shape[1]

    # Zero-pad the bottleneck dim to a multiple of 128 lanes (exact; padded columns/rows
    # contribute relu(0 + 0) * 0 = 0).
    bk = _round_up(bneck, 128)
    if bk != bneck:
        pad = bk - bneck
        wd = jnp.pad(wd, ((0, 0), (0, pad)))
        bd = jnp.pad(bd, ((0, 0), (0, pad)))
        wu = jnp.pad(wu, ((0, pad), (0, 0)))
    bd = bd.reshape(1, bk)
    bu = bu.reshape(1, D)

    # Row tile: as large as requested (multiple of 8 f32 sublanes), clamped to the token count.
    # Token count is padded up to a tile multiple instead of asserting divisibility.
    tm_eff = min(tm, _round_up(N, 8))
    n_pad = _round_up(N, tm_eff)
    if n_pad != N:
        x2 = jnp.pad(x2, ((0, n_pad - N), (0, 0)))

    x_bytes = jnp.dtype(x.dtype).itemsize
    w_bytes = jnp.dtype(wd.dtype).itemsize
    # x tile + out tile (double-buffered) + weights/biases (double-buffered) + f32 intermediate.
    vmem_needed = (2 * 2 * tm_eff * D * x_bytes
                   + 2 * (2 * D * bk + bk + D) * w_bytes
                   + 4 * tm_eff * bk * 4)
    # Keep headroom; stays well under v7x's 64 MiB for the default tm, raise tm on v5e/v6e.
    vmem_limit = min(127 << 20, max(32 << 20, int(1.5 * vmem_needed)))

    flops = 4 * n_pad * D * bk                     # two matmuls
    bytes_accessed = 2 * n_pad * D * x_bytes + (2 * D * bk + bk + D) * w_bytes

    # TODO(synk): a learnable adapter_scalar (nn.Parameter) would need to be passed as an
    # SMEM scalar instead of being baked in as a trace-time constant; a residual tensor
    # different from x would need one extra streamed input.
    kernel = functools.partial(adapter_kernel, scale=float(scale))

    out = pl.pallas_call(
        kernel,
        out_shape=jax.ShapeDtypeStruct((n_pad, D), x.dtype),
        grid_spec=pltpu.PrefetchScalarGridSpec(
            num_scalar_prefetch=0,
            grid=(n_pad // tm_eff,),
            in_specs=[
                pl.BlockSpec((tm_eff, D), lambda i: (i, 0)),   # x tile (also the residual)
                pl.BlockSpec((D, bk), lambda i: (0, 0)),       # W_down (resident)
                pl.BlockSpec((1, bk), lambda i: (0, 0)),       # b_down (resident)
                pl.BlockSpec((bk, D), lambda i: (0, 0)),       # W_up (resident)
                pl.BlockSpec((1, D), lambda i: (0, 0)),        # b_up (resident)
            ],
            out_specs=pl.BlockSpec((tm_eff, D), lambda i: (i, 0)),
        ),
        compiler_params=pltpu.CompilerParams(
            dimension_semantics=("parallel",),                 # megacore sharding of the row loop
            vmem_limit_bytes=vmem_limit),
        cost_estimate=pl.CostEstimate(
            flops=flops, transcendentals=0, bytes_accessed=bytes_accessed),
        # input_output_aliases={0: 0} would let the output reuse x2's HBM buffer; left off by
        # default because it requires the caller to donate x.
    )(x2, wd, bd, wu, bu)

    if n_pad != N:
        out = out[:N]
    return out.reshape(B, S, D)


def init_adapter_params(key, d_model, bottleneck_dim):
    """Matches init_weights: Linear weight ~ N(0, 0.02), bias = 0, LN weight=1/bias=0."""
    k_down, k_up = jax.random.split(key, 2)
    # PyTorch nn.Linear stores weight (out, in); we store pre-transposed (in, out)
    # so the kernel computes x @ W directly.
    w_down = 0.02 * jax.random.normal(k_down, (d_model, bottleneck_dim), jnp.float32)
    b_down = jnp.zeros((1, bottleneck_dim), jnp.float32)
    w_up = 0.02 * jax.random.normal(k_up, (bottleneck_dim, d_model), jnp.float32)
    b_up = jnp.zeros((1, d_model), jnp.float32)
    # LayerNorm params exist in the module but are unused in forward for option='in'.
    ln_w = jnp.ones((d_model,), jnp.float32)
    ln_b = jnp.zeros((d_model,), jnp.float32)
    return {"w_down": w_down, "b_down": b_down, "w_up": w_up, "b_up": b_up,
            "ln_w": ln_w, "ln_b": ln_b}


def parallel_adapter_ref(x, params, *, scale=1.0):
    down = jnp.maximum(x @ params["w_down"] + params["b_down"][0], 0.0)
    up = (down @ params["w_up"] + params["b_up"][0]) * scale
    return up + x


if __name__ == "__main__":
    B, S, D, BNECK = 2, 8, 32, 16
    key = jax.random.PRNGKey(0)
    k_x, k_p = jax.random.split(key)
    x = jax.random.normal(k_x, (B, S, D), jnp.float32)
    params = init_adapter_params(k_p, D, BNECK)

    # f32 path
    out = jax.block_until_ready(parallel_adapter(x, params, scale=1.0))
    ref = parallel_adapter_ref(x, params, scale=1.0)
    assert out.shape == (B, S, D)
    assert jnp.allclose(out, ref, atol=1e-5, rtol=1e-5)

    # ragged token count (N=14) with a small tile: exercises pad-to-tile + slice path
    x_r = jax.random.normal(k_x, (2, 7, D), jnp.float32)
    out_r = jax.block_until_ready(parallel_adapter(x_r, params, scale=1.0, tm=8))
    ref_r = parallel_adapter_ref(x_r, params, scale=1.0)
    assert jnp.allclose(out_r, ref_r, atol=1e-5, rtol=1e-5)

    # bf16 I/O path (bf16 MXU, f32 epilogue) — looser tolerance vs the f32 reference
    x_b = x.astype(jnp.bfloat16)
    params_b = {k: v.astype(jnp.bfloat16) for k, v in params.items()}
    out_b = jax.block_until_ready(parallel_adapter(x_b, params_b, scale=1.0))
    assert jnp.allclose(out_b.astype(jnp.float32), ref, atol=5e-2, rtol=5e-2)

    print("KERNEL_OK")
</pallas_src>

<mosaic_0001>
module attributes {stable_mosaic.version = 11 : i64} {
  func.func @adapter_kernel(%arg0: i32, %arg1: memref<16x32xf32, #tpu.memory_space<vmem>>, %arg2: memref<32x128xf32, #tpu.memory_space<vmem>>, %arg3: memref<1x128xf32, #tpu.memory_space<vmem>>, %arg4: memref<128x32xf32, #tpu.memory_space<vmem>>, %arg5: memref<1x32xf32, #tpu.memory_space<vmem>>, %arg6: memref<16x32xf32, #tpu.memory_space<vmem>>) attributes {dimension_semantics = [#tpu.dimension_semantics<parallel>], iteration_bounds = array<i64: 1>, scalar_prefetch = 0 : i64, scratch_operands = 0 : i64, tpu.core_type = #tpu.core_type<tc>, window_params = [{transform_indices = @transform_0, window_bounds = array<i64: 16, 32>}, {pipeline_mode = #tpu.pipeline_mode<synchronous>, transform_indices = @transform_1, window_bounds = array<i64: 32, 128>}, {pipeline_mode = #tpu.pipeline_mode<synchronous>, transform_indices = @transform_2, window_bounds = array<i64: 1, 128>}, {pipeline_mode = #tpu.pipeline_mode<synchronous>, transform_indices = @transform_3, window_bounds = array<i64: 128, 32>}, {pipeline_mode = #tpu.pipeline_mode<synchronous>, transform_indices = @transform_4, window_bounds = array<i64: 1, 32>}, {transform_indices = @transform_5, window_bounds = array<i64: 16, 32>}]} {
    %c0 = arith.constant 0 : index
    %c0_0 = arith.constant 0 : index
    %0 = vector.load %arg1[%c0, %c0_0] : memref<16x32xf32, #tpu.memory_space<vmem>>, vector<16x32xf32>
    %c0_1 = arith.constant 0 : index
    %c0_2 = arith.constant 0 : index
    %1 = vector.load %arg2[%c0_1, %c0_2] : memref<32x128xf32, #tpu.memory_space<vmem>>, vector<32x128xf32>
    %cst = arith.constant dense<0.000000e+00> : vector<16x128xf32>
    %2 = tpu.matmul %0, %1, %cst {dimension_numbers = #tpu.dot_dimension_numbers<[1], [0], [0], [1], [0, 0, 1, 1], [], []>} : vector<16x32xf32>, vector<32x128xf32>, vector<16x128xf32> -> vector<16x128xf32>
    %c0_3 = arith.constant 0 : index
    %c0_4 = arith.constant 0 : index
    %3 = vector.load %arg3[%c0_3, %c0_4] : memref<1x128xf32, #tpu.memory_space<vmem>>, vector<1x128xf32>
    %4 = vector.broadcast %3 : vector<1x128xf32> to vector<16x128xf32>
    %5 = arith.addf %2, %4 : vector<16x128xf32>
    %cst_5 = arith.constant 0.000000e+00 : f32
    %6 = vector.broadcast %cst_5 : f32 to vector<16x128xf32>
    %7 = arith.maximumf %5, %6 : vector<16x128xf32>
    %c0_6 = arith.constant 0 : index
    %c0_7 = arith.constant 0 : index
    %8 = vector.load %arg4[%c0_6, %c0_7] : memref<128x32xf32, #tpu.memory_space<vmem>>, vector<128x32xf32>
    %cst_8 = arith.constant dense<0.000000e+00> : vector<16x32xf32>
    %9 = tpu.matmul %7, %8, %cst_8 {dimension_numbers = #tpu.dot_dimension_numbers<[1], [0], [0], [1], [0, 0, 1, 1], [], []>} : vector<16x128xf32>, vector<128x32xf32>, vector<16x32xf32> -> vector<16x32xf32>
    %c0_9 = arith.constant 0 : index
    %c0_10 = arith.constant 0 : index
    %10 = vector.load %arg5[%c0_9, %c0_10] : memref<1x32xf32, #tpu.memory_space<vmem>>, vector<1x32xf32>
    %11 = vector.broadcast %10 : vector<1x32xf32> to vector<16x32xf32>
    %12 = arith.addf %9, %11 : vector<16x32xf32>
    %cst_11 = arith.constant 1.000000e+00 : f32
    %13 = vector.broadcast %cst_11 : f32 to vector<16x32xf32>
    %14 = arith.mulf %12, %13 : vector<16x32xf32>
    %15 = arith.addf %14, %0 : vector<16x32xf32>
    %c0_12 = arith.constant 0 : index
    %c0_13 = arith.constant 0 : index
    %16 = vector.load %arg6[%c0_12, %c0_13] : memref<16x32xf32, #tpu.memory_space<vmem>>, vector<16x32xf32>
    tpu.vector_store %arg6[%c0_12, %c0_13], %15 {strides = array<i32>} : memref<16x32xf32, #tpu.memory_space<vmem>>, vector<16x32xf32>,
    return
  }
  func.func @transform_0(%arg0: i32) -> (i32, i32) {
    %c0_i32 = arith.constant 0 : i32
    %c0_i32_0 = arith.constant 0 : i32
    return %arg0, %c0_i32 : i32, i32
  }
  func.func @transform_1(%arg0: i32) -> (i32, i32) {
    %c0_i32 = arith.constant 0 : i32
    %c0_i32_0 = arith.constant 0 : i32
    %c0_i32_1 = arith.constant 0 : i32
    return %c0_i32, %c0_i32_0 : i32, i32
  }
  func.func @transform_2(%arg0: i32) -> (i32, i32) {
    %c0_i32 = arith.constant 0 : i32
    %c0_i32_0 = arith.constant 0 : i32
    %c0_i32_1 = arith.constant 0 : i32
    return %c0_i32, %c0_i32_0 : i32, i32
  }
  func.func @transform_3(%arg0: i32) -> (i32, i32) {
    %c0_i32 = arith.constant 0 : i32
    %c0_i32_0 = arith.constant 0 : i32
    %c0_i32_1 = arith.constant 0 : i32
    return %c0_i32, %c0_i32_0 : i32, i32
  }
  func.func @transform_4(%arg0: i32) -> (i32, i32) {
    %c0_i32 = arith.constant 0 : i32
    %c0_i32_0 = arith.constant 0 : i32
    %c0_i32_1 = arith.constant 0 : i32
    return %c0_i32, %c0_i32_0 : i32, i32
  }
  func.func @transform_5(%arg0: i32) -> (i32, i32) {
    %c0_i32 = arith.constant 0 : i32
    %c0_i32_0 = arith.constant 0 : i32
    return %arg0, %c0_i32 : i32, i32
  }
}

</mosaic_0001>

<bundles_post_ra>
// kernel: tpu_custom_call.1
= control target key start
LH: loop header
LB: loop body
LE: loop exit
PB: predicated region body
PF: predicated region fallthrough
CT: control target
= control target key end

     0   :  { %vm34_vm0 = vcmask 261120   ;;  %s451_s0 = inlined_call_operand.vmem [shape: f32[16,32], index: 0, kind: input, shape index: {}]   ;;  %s452_s1 = inlined_call_operand.vmem [shape: f32[32,128], index: 1, kind: input, shape index: {}]   ;;  %s453_s2 = inlined_call_operand.vmem [shape: f32[1,128], index: 2, kind: input, shape index: {}]   ;;  %s454_s3 = inlined_call_operand.vmem [shape: f32[128,32], index: 3, kind: input, shape index: {}]   ;;  %s455_s4 = inlined_call_operand.vmem [shape: f32[1,32], index: 4, kind: input, shape index: {}]   ;;  %s456_s5 = inlined_call_operand.hbm [shape: f32[16,32], index: 5, kind: output, shape index: {}]  }
   0x1   :  { %v26_v0 = vld [vmem:[%s452_s1 + $0x18] sm:$0xff]  ;;  %v25_v1 = vld [vmem:[%s452_s1 + $0x10] sm:$0xff]  ;;  %v377_v2 = vld [vmem:[%s451_s0] sm:$0xff] }
   0x2   :  { %264 = vmatprep.subr.mxu0 %v26_v0  ;;  %v24_v3 = vld [vmem:[%s452_s1 + $0x8] sm:$0xff]  ;;  %272 = vmatprep.mubr.msk.f32.mxu0 %vm34_vm0, %v377_v2  ;;  %v133_v4 = vld [vmem:[%s454_s3 + $0x78] sm:$0xff]  ;;  %v132_v5 = vld [vmem:[%s454_s3 + $0x70] sm:$0xff] }
   0x3   :  { %265 = vmatpush3.msra.mxu0 %v26_v0  ;;  %275 = vmatprep.subr.mxu1 %v133_v4  ;;  %v23_v6 = vld [vmem:[%s452_s1] sm:$0xff]  ;;  %v131_v7 = vld [vmem:[%s454_s3 + $0x68] sm:$0xff] }
   0x4   :  { %266 = vmatprep.subr.mxu0 %v25_v1  ;;  %276 = vmatpush3.msra.mxu1 %v133_v4  ;;  %v22_v8 = vld [vmem:[%s451_s0 + $0x8] sm:$0xff]  ;;  %v130_v9 = vld [vmem:[%s454_s3 + $0x60] sm:$0xff] }
   0x5   :  { %267 = vmatpush3.msra.mxu0 %v25_v1  ;;  %277 = vmatprep.subr.mxu1 %v132_v5 }
   0x6   :  { %268 = vmatprep.subr.mxu0 %v24_v3  ;;  %278 = vmatpush3.msra.mxu1 %v132_v5 }
   0x7   :  { %269 = vmatpush3.msra.mxu0 %v24_v3 }
   0x8   :  { %10 = vsyncpa [#allocation3], 0  ;;  %270 = vmatprep.subr.mxu0 %v23_v6  ;;  %279 = vmatprep.subr.mxu1 %v131_v7  ;;  %v129_v10 = vld [vmem:[%s454_s3 + $0x58] sm:$0xff]  ;;  %v128_v11 = vld [vmem:[%s454_s3 + $0x50] sm:$0xff] }
   0x9   :  { %271 = vmatpush3.msra.mxu0 %v23_v6  ;;  %280 = vmatpush3.msra.mxu1 %v131_v7  ;;  %v127_v12 = vld [vmem:[%s454_s3 + $0x48] sm:$0xff]  ;;  %v126_v13 = vld [vmem:[%s454_s3 + $0x40] sm:$0xff]  ;;  %v125_v14 = vld [vmem:[%s454_s3 + $0x38] sm:$0xff] }
   0xa   :  { %273 = vmatmul.mubr.msk.f32.vlgmr.msra.gmra.mxu0 %vm34_vm0, %v22_v8  ;;  %281 = vmatprep.subr.mxu1 %v130_v9  ;;  %v124_v15 = vld [vmem:[%s454_s3 + $0x30] sm:$0xff]  ;;  %v123_v16 = vld [vmem:[%s454_s3 + $0x28] sm:$0xff]  ;;  %v122_v17 = vld [vmem:[%s454_s3 + $0x20] sm:$0xff] }
   0xb   :  { %282 = vmatpush3.msra.mxu1 %v130_v9  ;;  %v121_v18 = vld [vmem:[%s454_s3 + $0x18] sm:$0xff]  ;;  %v120_v19 = vld [vmem:[%s454_s3 + $0x10] sm:$0xff]  ;;  %v119_v20 = vld [vmem:[%s454_s3 + $0x8] sm:$0xff] }
   0xc   :  { %283 = vmatprep.subr.mxu1 %v129_v10  ;;  %v118_v21 = vld [vmem:[%s454_s3] sm:$0xff]  ;;  %s335_s3 = smov [#allocation2]  }
   0xd   :  { %284 = vmatpush3.msra.mxu1 %v129_v10  ;;  %v236_v22 = vld [vmem:[%s453_s2] ss:$0 sm:$0xff]  ;;  %s225_s13 = sshll.u32 %s335_s3, 4  ;;  %s226_s13 = int_to_ptr.vmem [resolvable:$true] %s225_s13 }
   0xe   :  { %285 = vmatprep.subr.mxu1 %v128_v11  ;;  %v239_v29 = vld [vmem:[%s455_s4] ss:$0 sm:$0xff]  ;;  %s313_s2 = scalar_lea.vmem %s226_s13, 256  ;;  %p318_p1 = scmp.lt.s32.totalorder %s226_s13, %s226_s13 }
   0xf   :  { %286 = vmatpush3.msra.mxu1 %v128_v11  ;;  %p314_p0 = scmp.ne.s32.totalorder %s226_s13, %s313_s2  ;;  %p319_p2 = scmp.lt.s32.totalorder %s313_s2, %s313_s2 }
  0x10   :  { %287 = vmatprep.subr.mxu1 %v127_v12 }
  0x11   :  { %288 = vmatpush3.msra.mxu1 %v127_v12  ;;  %p320_p3 = por %p319_p2, %p318_p1 }
  0x12   :  { %289 = vmatprep.subr.mxu1 %v126_v13 }
  0x13   :  { %290 = vmatpush3.msra.mxu1 %v126_v13  ;;  %p321_p4 = pnand %p320_p3, %p314_p0 }
  0x14   :  { %291 = vmatprep.subr.mxu1 %v125_v14 }
  0x15   :  { %292 = vmatpush3.msra.mxu1 %v125_v14 }
  0x16   :  { %293 = vmatprep.subr.mxu1 %v124_v15 }
  0x17   :  { %294 = vmatpush3.msra.mxu1 %v124_v15 }
  0x18   :  { %295 = vmatprep.subr.mxu1 %v123_v16 }
  0x19   :  { %296 = vmatpush3.msra.mxu1 %v123_v16 }
  0x1a   :  { %297 = vmatprep.subr.mxu1 %v122_v17 }
  0x1b   :  { %298 = vmatpush3.msra.mxu1 %v122_v17 }
  0x1c   :  { %299 = vmatprep.subr.mxu1 %v121_v18 }
  0x1d   :  { %300 = vmatpush3.msra.mxu1 %v121_v18 }
  0x1e   :  { %301 = vmatprep.subr.mxu1 %v120_v19 }
  0x1f   :  { %302 = vmatpush3.msra.mxu1 %v120_v19 }
  0x20   :  { %303 = vmatprep.subr.mxu1 %v119_v20 }
  0x21   :  { %304 = vmatpush3.msra.mxu1 %v119_v20 }
  0x22   :  { %305 = vmatprep.subr.mxu1 %v118_v21 }
  0x23   :  { %306 = vmatpush3.msra.mxu1 %v118_v21 }
  0xca   :  { %v274_v23 = vpop.f32.mrf.mxu0 }
  0xcb   :  { %v113_v24 = vadd.f32 %v274_v23, %v236_v22 }
  0xcc   :  { %v107_v25 = vpop.f32.mrf.mxu0 }
  0xcd   :  { %v108_v26 = vadd.f32 %v236_v22, %v107_v25  ;;  %v117_v28 = vmax.f32 %v113_v24, 0.0 }
  0xcf   :  { %v116_v27 = vmax.f32 %v108_v26, 0.0 }
  0xd1   :  { %307 = vmatprep.mubr.f32.mxu1 %v116_v27 }
  0xd2   :  { %308 = vmatmul.mubr.f32.vlgmr.msra.gmra.mxu1 %v117_v28 }
 0x192   :  { %v309_v30 = vpop.f32.mrf.mxu1 }
 0x193   :  { %v213_v31 = vadd.f32 %v309_v30, %v239_v29 }
 0x194   :  { %v207_v32 = vpop.f32.mrf.mxu1 }
 0x195   :  { %v217_v33 = vadd.f32 %v213_v31, %v22_v8  ;;  %v208_v34 = vadd.f32 %v239_v29, %v207_v32 }
 0x197   :  { %219 = vst.msk [vmem:[#allocation2 + $0x8] sm:$0xff] %vm34_vm0, %v217_v33  ;;  %v216_v35 = vadd.f32 %v208_v34, %v377_v2 }
 0x199   :  { %218 = vst.msk [vmem:[#allocation2] sm:$0xff] %vm34_vm0, %v216_v35 }
 0x19a   :  { %324 = shalt.err (!%p321_p4)
}
 0x19b   :  { %s336_s4 = smov 128   ;;  %s337_s14 = smov 8  }
 0x19c   :  { %231 = dma.vmem_to_hbm [thread:$0]  %s226_s13, 256, %s456_s5, [#allocation3], %s336_s4, %s336_s4, %s337_s14  }
 0x19d   :  { %333 = dma.done.wait [#allocation3], 256  }
 0x19e   :  { %334 = vsyncadd [#allocation3], 4294967040 }
 0x19f   :  { %235 = vsyncpa [#allocation3], 1 }

</bundles_post_ra>
